<compile_context>
chip_gen: v7x
topology: tpu7x:2x2x1
jax: 0.10.0
libtpu: 0.0.40
codegen_flags: <defaults>
</compile_context>

<pallas_src>
import functools

import jax
import jax.numpy as jnp
from jax import lax
from jax.experimental import pallas as pl
from jax.experimental.pallas import tpu as pltpu


def conv3x3_tanh_kernel(xb_ref, xt_ref, xo_ref, w_ref, o_ref, acc_ref, *, W, R, HB, CP):
    """One (image, row-band) per grid step, flattened-NCHW layout.

    xb_ref:  (1, Cin, R*W)    band of R image rows (VMEM)
    xt_ref:  (1, Cin, HB*W)   block whose LAST row is the row just above the band
    xo_ref:  (1, Cin, HB*W)   block whose FIRST row is the row just below the band
    w_ref:   (3, 3*CP, Cin)   weights; axis0 = dx, rows = (dy=-1, dy=0, dy=+1)*CP
    o_ref:   (1, 3, R*W)      output band (lane-dense store over R*W)
    acc_ref: (CP, R*W) f32    accumulator scratch
    """
    b = pl.program_id(1)
    nb = pl.num_programs(1)
    f32 = jnp.float32
    RW = R * W
    HBW = HB * W
    pow2 = (W & (W - 1)) == 0

    def col_of(n_lanes):  # per-lane column index (period W)
        pos = lax.broadcasted_iota(jnp.int32, (1, n_lanes), 1)
        return (pos & (W - 1)) if pow2 else (pos % W)  # TODO(synk): check s32 rem for odd W

    # ---- band and its two column-shifted variants (2 XLU rolls + 2 masks, hoisted) ----
    x0 = xb_ref[0]                                                        # (Cin, R*W)
    col = col_of(RW)
    xL = jnp.where(col >= 1, pltpu.roll(x0, 1, axis=1), 0.0)              # x[., r, c-1]
    xR = jnp.where(col <= W - 2, pltpu.roll(x0, RW - 1, axis=1), 0.0)     # x[., r, c+1]

    # ---- halo rows just above / below the band (zeroed at the image border) ----
    xt = xt_ref[0]                                                        # (Cin, HB*W)
    xo = xo_ref[0]
    hcol = col_of(HBW)
    t0 = (HB - 1) * W
    top = xt[:, t0:t0 + W]
    topL = jnp.where(hcol >= 1, pltpu.roll(xt, 1, axis=1), 0.0)[:, t0:t0 + W]
    topR = jnp.where(hcol <= W - 2, pltpu.roll(xt, HBW - 1, axis=1), 0.0)[:, t0:t0 + W]
    bot = xo[:, 0:W]
    botL = jnp.where(hcol >= 1, pltpu.roll(xo, 1, axis=1), 0.0)[:, 0:W]
    botR = jnp.where(hcol <= W - 2, pltpu.roll(xo, HBW - 1, axis=1), 0.0)[:, 0:W]

    # ---- one MXU dot per dx; result rows are the (dy=-1, dy=0, dy=+1) partials ----
    Zm1 = jnp.zeros((CP, RW), f32)
    Z0 = jnp.zeros((CP, RW), f32)
    Zp1 = jnp.zeros((CP, RW), f32)
    topc = jnp.zeros((CP, W), f32)
    botc = jnp.zeros((CP, W), f32)
    for dxi, (Y, tY, bY) in enumerate(((xL, topL, botL), (x0, top, bot), (xR, topR, botR))):
        Wd = w_ref[dxi]                                                   # (3*CP, Cin)
        P = jnp.dot(Wd, Y, preferred_element_type=f32)                    # (3*CP, R*W)
        Zm1 = Zm1 + P[0:CP]
        Z0 = Z0 + P[CP:2 * CP]
        Zp1 = Zp1 + P[2 * CP:3 * CP]
        topc = topc + jnp.dot(Wd[0:CP], tY, preferred_element_type=f32)          # dy=-1 · halo above
        botc = botc + jnp.dot(Wd[2 * CP:3 * CP], bY, preferred_element_type=f32)  # dy=+1 · halo below
    topc = topc * (b > 0).astype(f32)            # first band: the row above is zero padding
    botc = botc * (b < nb - 1).astype(f32)       # last band: the row below is zero padding

    # ---- assemble: dy=0 in place, dy=+-1 via +-W lane-offset adds, halos on the edge rows ----
    acc_ref[...] = Z0
    if RW > W:  # static
        acc_ref[:, pl.ds(0, RW - W)] += Zp1[:, W:RW]      # out row r  += (dy=+1) @ band row r+1
        acc_ref[:, pl.ds(W, RW - W)] += Zm1[:, 0:RW - W]  # out row r  += (dy=-1) @ band row r-1
    acc_ref[:, pl.ds(RW - W, W)] += botc                  # last band row <- halo below
    acc_ref[:, pl.ds(0, W)] += topc                       # first band row <- halo above

    o_ref[0] = jnp.tanh(acc_ref[0:3, :]).astype(o_ref.dtype)


def _vmem_budget():
    """(band-selection budget, vmem_limit_bytes) derived from physical VMEM."""
    cap = 64 * 1024 * 1024
    try:
        info = pltpu.get_tpu_info()
        cap = int(getattr(info, "vmem_capacity_bytes", cap) or cap)
    except Exception:
        pass
    return cap // 3, min(cap // 2, 96 * 1024 * 1024)


def _choose_band_rows(H, W, Cin, CP, hb, n_batch, budget_bytes):
    """Rows per band: multiple of hb, divides H, fits the VMEM budget, enough bands."""
    if hb >= H or H % hb != 0:
        return H

    def est(r):  # rough f32 live bytes per band (in bufs, xL/xR, dot results, acc, out, halos)
        return 4 * r * W * (4 * Cin + 8 * CP + 6) + 16 * hb * W * Cin

    cands = [r for r in range(hb, H + 1, hb) if H % r == 0]
    fits = [r for r in cands if est(r) <= budget_bytes] or [hb]
    want_bands = max(2, -(-8 // max(n_batch, 1)))   # feed both v7x TCs even for N=1
    pref = [r for r in fits if H // r >= want_bands]
    return max(pref) if pref else min(fits)


def get_image_g(h_code_nchw, weight_oihw):
    """Forward of GET_IMAGE_G: tanh(conv3x3(h_code, out=3, padding=1, no bias)).

    h_code_nchw: (N, ngf, H, W) float32
    weight_oihw: (3, ngf, 3, 3) float32 (PyTorch OIHW, bias-free)
    returns:     (N, 3, H, W) float32
    """
    N, Cin, H, W = h_code_nchw.shape
    Cout, Cin_w, KH, KW = weight_oihw.shape
    assert (Cin_w, KH, KW) == (Cin, 3, 3) and Cout <= 8
    CP = 8                       # Cout padded to a full sublane tile for the dots
    HW = H * W

    # Halo-block row granularity: its last block dim (hb*W) must be 128-aligned or full.
    if W % 128 == 0:
        hb = 1
    elif (8 * W) % 128 == 0 and H % 8 == 0:
        hb = 8
    else:
        hb = H  # TODO(synk): odd W -> no banding; halo blocks degenerate to the full image.

    budget, vmem_limit = _vmem_budget()
    R = _choose_band_rows(H, W, Cin, CP, hb, N, budget)
    nb = H // R
    rb = R // hb                 # halo blocks per band

    # Flatten spatial dims (free, row-major) -> R*W on lanes inside the kernel.
    x_flat = h_code_nchw.reshape(N, Cin, HW)
    # OIHW -> (kw, kh, co, ci), pad co 3->CP, fold (kh, co): rows = (dy=-1,0,+1)*CP.
    wp = jnp.transpose(weight_oihw, (3, 2, 0, 1))
    wp = jnp.pad(wp, ((0, 0), (0, 0), (0, CP - Cout), (0, 0)))
    w_stack = wp.reshape(3, 3 * CP, Cin)

    kernel = functools.partial(conv3x3_tanh_kernel, W=W, R=R, HB=hb, CP=CP)

    out_flat = pl.pallas_call(
        kernel,
        out_shape=jax.ShapeDtypeStruct((N, Cout, HW), h_code_nchw.dtype),
        grid=(N, nb),
        in_specs=[
            # band of R rows
            pl.BlockSpec((1, Cin, R * W), lambda n, b: (n, 0, b)),
            # block whose last row sits just above the band (clamped at the top edge)
            pl.BlockSpec((1, Cin, hb * W),
                         lambda n, b: (n, 0, jnp.maximum(b * rb - 1, 0))),
            # block whose first row sits just below the band (clamped at the bottom edge)
            pl.BlockSpec((1, Cin, hb * W),
                         lambda n, b: (n, 0, jnp.minimum((b + 1) * rb, H // hb - 1))),
            # weights (tiny, replicated to every step)
            pl.BlockSpec((3, 3 * CP, Cin), lambda n, b: (0, 0, 0)),
        ],
        out_specs=pl.BlockSpec((1, Cout, R * W), lambda n, b: (n, 0, b)),
        scratch_shapes=[pltpu.VMEM((CP, R * W), jnp.float32)],
        compiler_params=pltpu.CompilerParams(
            dimension_semantics=("parallel", "parallel"),
            vmem_limit_bytes=vmem_limit,
        ),
    )(x_flat, x_flat, x_flat, w_stack)

    # Free reshape back to NCHW image layout (no transpose needed).
    return out_flat.reshape(N, Cout, H, W)


def _reference(h_code_nchw, weight_oihw):
    """Plain-JAX reference (lax conv) for the correctness check."""
    y = lax.conv_general_dilated(
        h_code_nchw, weight_oihw,
        window_strides=(1, 1), padding="SAME",
        dimension_numbers=("NCHW", "OIHW", "NCHW"),
        precision=lax.Precision.HIGHEST,
    )
    return jnp.tanh(y)


if __name__ == "__main__":
    key = jax.random.PRNGKey(0)
    k_x, k_w = jax.random.split(key)

    N, ngf, H, W = 2, 8, 16, 16
    h_code = jax.random.normal(k_x, (N, ngf, H, W), dtype=jnp.float32)
    # conv3x3(ngf, 3): weight shape (3, ngf, 3, 3), bias=False
    weight = 0.1 * jax.random.normal(k_w, (3, ngf, 3, 3), dtype=jnp.float32)

    out = jax.block_until_ready(get_image_g(h_code, weight))
    ref = jax.block_until_ready(_reference(h_code, weight))

    assert out.shape == (N, 3, H, W)
    # Tolerance covers MXU accumulation-order / precision-mode differences vs XLA conv.
    assert jnp.allclose(out, ref, atol=2e-3, rtol=2e-3), "mismatch vs reference"

    print("KERNEL_OK")
</pallas_src>

<mosaic_0001>
module attributes {stable_mosaic.version = 11 : i64} {
  func.func @conv3x3_tanh_kernel(%arg0: i32, %arg1: i32, %arg2: memref<1x8x128xf32, #tpu.memory_space<vmem>>, %arg3: memref<1x8x128xf32, #tpu.memory_space<vmem>>, %arg4: memref<1x8x128xf32, #tpu.memory_space<vmem>>, %arg5: memref<3x24x8xf32, #tpu.memory_space<vmem>>, %arg6: memref<1x3x128xf32, #tpu.memory_space<vmem>>, %arg7: memref<8x128xf32, #tpu.memory_space<vmem>>) attributes {dimension_semantics = [#tpu.dimension_semantics<parallel>, #tpu.dimension_semantics<parallel>], iteration_bounds = array<i64: 2, 2>, scalar_prefetch = 0 : i64, scratch_operands = 1 : i64, tpu.core_type = #tpu.core_type<tc>, window_params = [{transform_indices = @transform_0, window_bounds = array<i64: 1, 8, 128>}, {transform_indices = @transform_1, window_bounds = array<i64: 1, 8, 128>}, {transform_indices = @transform_2, window_bounds = array<i64: 1, 8, 128>}, {pipeline_mode = #tpu.pipeline_mode<synchronous>, transform_indices = @transform_3, window_bounds = array<i64: 3, 24, 8>}, {transform_indices = @transform_4, window_bounds = array<i64: 1, 3, 128>}]} {
    %c0 = arith.constant 0 : index
    %c0_0 = arith.constant 0 : index
    %c0_1 = arith.constant 0 : index
    %0 = vector.load %arg2[%c0, %c0_0, %c0_1] : memref<1x8x128xf32, #tpu.memory_space<vmem>>, vector<1x8x128xf32>
    %1 = vector.shape_cast %0 : vector<1x8x128xf32> to vector<8x128xf32>
    %2 = tpu.iota {dimensions = array<i32: 1>} : vector<1x128xi32>
    %c15_i32 = arith.constant 15 : i32
    %3 = vector.broadcast %c15_i32 : i32 to vector<1x128xi32>
    %4 = arith.andi %2, %3 : vector<1x128xi32>
    %c1_i32 = arith.constant 1 : i32
    %5 = vector.broadcast %c1_i32 : i32 to vector<1x128xi32>
    %6 = arith.cmpi sge, %4, %5 : vector<1x128xi32>
    %c1_i32_2 = arith.constant 1 : i32
    %7 = tpu.dynamic_rotate %1 by %c1_i32_2 dim 1 : vector<8x128xf32>, i32 -> vector<8x128xf32>
    %cst = arith.constant 0.000000e+00 : f32
    %8 = vector.shape_cast %6 : vector<1x128xi1> to vector<1x128xi1>
    %9 = vector.broadcast %8 : vector<1x128xi1> to vector<8x128xi1>
    %10 = vector.broadcast %cst : f32 to vector<8x128xf32>
    %11 = arith.select %9, %7, %10 : vector<8x128xi1>, vector<8x128xf32>
    %c14_i32 = arith.constant 14 : i32
    %12 = vector.broadcast %c14_i32 : i32 to vector<1x128xi32>
    %13 = arith.cmpi sle, %4, %12 : vector<1x128xi32>
    %c127_i32 = arith.constant 127 : i32
    %14 = tpu.dynamic_rotate %1 by %c127_i32 dim 1 : vector<8x128xf32>, i32 -> vector<8x128xf32>
    %cst_3 = arith.constant 0.000000e+00 : f32
    %15 = vector.shape_cast %13 : vector<1x128xi1> to vector<1x128xi1>
    %16 = vector.broadcast %15 : vector<1x128xi1> to vector<8x128xi1>
    %17 = vector.broadcast %cst_3 : f32 to vector<8x128xf32>
    %18 = arith.select %16, %14, %17 : vector<8x128xi1>, vector<8x128xf32>
    %c0_4 = arith.constant 0 : index
    %c0_5 = arith.constant 0 : index
    %c0_6 = arith.constant 0 : index
    %19 = vector.load %arg3[%c0_4, %c0_5, %c0_6] : memref<1x8x128xf32, #tpu.memory_space<vmem>>, vector<1x8x128xf32>
    %20 = vector.shape_cast %19 : vector<1x8x128xf32> to vector<8x128xf32>
    %c0_7 = arith.constant 0 : index
    %c0_8 = arith.constant 0 : index
    %c0_9 = arith.constant 0 : index
    %21 = vector.load %arg4[%c0_7, %c0_8, %c0_9] : memref<1x8x128xf32, #tpu.memory_space<vmem>>, vector<1x8x128xf32>
    %22 = vector.shape_cast %21 : vector<1x8x128xf32> to vector<8x128xf32>
    %23 = tpu.iota {dimensions = array<i32: 1>} : vector<1x128xi32>
    %c15_i32_10 = arith.constant 15 : i32
    %24 = vector.broadcast %c15_i32_10 : i32 to vector<1x128xi32>
    %25 = arith.andi %23, %24 : vector<1x128xi32>
    %26 = vector.extract_strided_slice %20 {offsets = [0, 112], sizes = [8, 16], strides = [1, 1]} : vector<8x128xf32> to vector<8x16xf32>
    %c1_i32_11 = arith.constant 1 : i32
    %27 = vector.broadcast %c1_i32_11 : i32 to vector<1x128xi32>
    %28 = arith.cmpi sge, %25, %27 : vector<1x128xi32>
    %c1_i32_12 = arith.constant 1 : i32
    %29 = tpu.dynamic_rotate %20 by %c1_i32_12 dim 1 : vector<8x128xf32>, i32 -> vector<8x128xf32>
    %cst_13 = arith.constant 0.000000e+00 : f32
    %30 = vector.shape_cast %28 : vector<1x128xi1> to vector<1x128xi1>
    %31 = vector.broadcast %30 : vector<1x128xi1> to vector<8x128xi1>
    %32 = vector.broadcast %cst_13 : f32 to vector<8x128xf32>
    %33 = arith.select %31, %29, %32 : vector<8x128xi1>, vector<8x128xf32>
    %34 = vector.extract_strided_slice %33 {offsets = [0, 112], sizes = [8, 16], strides = [1, 1]} : vector<8x128xf32> to vector<8x16xf32>
    %c14_i32_14 = arith.constant 14 : i32
    %35 = vector.broadcast %c14_i32_14 : i32 to vector<1x128xi32>
    %36 = arith.cmpi sle, %25, %35 : vector<1x128xi32>
    %c127_i32_15 = arith.constant 127 : i32
    %37 = tpu.dynamic_rotate %20 by %c127_i32_15 dim 1 : vector<8x128xf32>, i32 -> vector<8x128xf32>
    %cst_16 = arith.constant 0.000000e+00 : f32
    %38 = vector.shape_cast %36 : vector<1x128xi1> to vector<1x128xi1>
    %39 = vector.broadcast %38 : vector<1x128xi1> to vector<8x128xi1>
    %40 = vector.broadcast %cst_16 : f32 to vector<8x128xf32>
    %41 = arith.select %39, %37, %40 : vector<8x128xi1>, vector<8x128xf32>
    %42 = vector.extract_strided_slice %41 {offsets = [0, 112], sizes = [8, 16], strides = [1, 1]} : vector<8x128xf32> to vector<8x16xf32>
    %43 = vector.extract_strided_slice %22 {offsets = [0, 0], sizes = [8, 16], strides = [1, 1]} : vector<8x128xf32> to vector<8x16xf32>
    %c1_i32_17 = arith.constant 1 : i32
    %44 = vector.broadcast %c1_i32_17 : i32 to vector<1x128xi32>
    %45 = arith.cmpi sge, %25, %44 : vector<1x128xi32>
    %c1_i32_18 = arith.constant 1 : i32
    %46 = tpu.dynamic_rotate %22 by %c1_i32_18 dim 1 : vector<8x128xf32>, i32 -> vector<8x128xf32>
    %cst_19 = arith.constant 0.000000e+00 : f32
    %47 = vector.shape_cast %45 : vector<1x128xi1> to vector<1x128xi1>
    %48 = vector.broadcast %47 : vector<1x128xi1> to vector<8x128xi1>
    %49 = vector.broadcast %cst_19 : f32 to vector<8x128xf32>
    %50 = arith.select %48, %46, %49 : vector<8x128xi1>, vector<8x128xf32>
    %51 = vector.extract_strided_slice %50 {offsets = [0, 0], sizes = [8, 16], strides = [1, 1]} : vector<8x128xf32> to vector<8x16xf32>
    %c14_i32_20 = arith.constant 14 : i32
    %52 = vector.broadcast %c14_i32_20 : i32 to vector<1x128xi32>
    %53 = arith.cmpi sle, %25, %52 : vector<1x128xi32>
    %c127_i32_21 = arith.constant 127 : i32
    %54 = tpu.dynamic_rotate %22 by %c127_i32_21 dim 1 : vector<8x128xf32>, i32 -> vector<8x128xf32>
    %cst_22 = arith.constant 0.000000e+00 : f32
    %55 = vector.shape_cast %53 : vector<1x128xi1> to vector<1x128xi1>
    %56 = vector.broadcast %55 : vector<1x128xi1> to vector<8x128xi1>
    %57 = vector.broadcast %cst_22 : f32 to vector<8x128xf32>
    %58 = arith.select %56, %54, %57 : vector<8x128xi1>, vector<8x128xf32>
    %59 = vector.extract_strided_slice %58 {offsets = [0, 0], sizes = [8, 16], strides = [1, 1]} : vector<8x128xf32> to vector<8x16xf32>
    %cst_23 = arith.constant 0.000000e+00 : f32
    %60 = vector.broadcast %cst_23 : f32 to vector<8x128xf32>
    %cst_24 = arith.constant 0.000000e+00 : f32
    %61 = vector.broadcast %cst_24 : f32 to vector<8x128xf32>
    %cst_25 = arith.constant 0.000000e+00 : f32
    %62 = vector.broadcast %cst_25 : f32 to vector<8x128xf32>
    %cst_26 = arith.constant 0.000000e+00 : f32
    %63 = vector.broadcast %cst_26 : f32 to vector<8x16xf32>
    %cst_27 = arith.constant 0.000000e+00 : f32
    %64 = vector.broadcast %cst_27 : f32 to vector<8x16xf32>
    %c0_28 = arith.constant 0 : index
    %c0_29 = arith.constant 0 : index
    %c0_30 = arith.constant 0 : index
    %65 = vector.load %arg5[%c0_28, %c0_29, %c0_30] : memref<3x24x8xf32, #tpu.memory_space<vmem>>, vector<1x24x8xf32>
    %66 = vector.shape_cast %65 : vector<1x24x8xf32> to vector<24x8xf32>
    %cst_31 = arith.constant dense<0.000000e+00> : vector<24x128xf32>
    %67 = tpu.matmul %66, %11, %cst_31 {dimension_numbers = #tpu.dot_dimension_numbers<[1], [0], [0], [1], [0, 0, 1, 1], [], []>} : vector<24x8xf32>, vector<8x128xf32>, vector<24x128xf32> -> vector<24x128xf32>
    %68 = vector.extract_strided_slice %67 {offsets = [0, 0], sizes = [8, 128], strides = [1, 1]} : vector<24x128xf32> to vector<8x128xf32>
    %69 = arith.addf %60, %68 : vector<8x128xf32>
    %70 = vector.extract_strided_slice %67 {offsets = [8, 0], sizes = [8, 128], strides = [1, 1]} : vector<24x128xf32> to vector<8x128xf32>
    %71 = arith.addf %61, %70 : vector<8x128xf32>
    %72 = vector.extract_strided_slice %67 {offsets = [16, 0], sizes = [8, 128], strides = [1, 1]} : vector<24x128xf32> to vector<8x128xf32>
    %73 = arith.addf %62, %72 : vector<8x128xf32>
    %74 = vector.extract_strided_slice %66 {offsets = [0, 0], sizes = [8, 8], strides = [1, 1]} : vector<24x8xf32> to vector<8x8xf32>
    %cst_32 = arith.constant dense<0.000000e+00> : vector<8x16xf32>
    %75 = tpu.matmul %74, %34, %cst_32 {dimension_numbers = #tpu.dot_dimension_numbers<[1], [0], [0], [1], [0, 0, 1, 1], [], []>} : vector<8x8xf32>, vector<8x16xf32>, vector<8x16xf32> -> vector<8x16xf32>
    %76 = arith.addf %63, %75 : vector<8x16xf32>
    %77 = vector.extract_strided_slice %66 {offsets = [16, 0], sizes = [8, 8], strides = [1, 1]} : vector<24x8xf32> to vector<8x8xf32>
    %cst_33 = arith.constant dense<0.000000e+00> : vector<8x16xf32>
    %78 = tpu.matmul %77, %51, %cst_33 {dimension_numbers = #tpu.dot_dimension_numbers<[1], [0], [0], [1], [0, 0, 1, 1], [], []>} : vector<8x8xf32>, vector<8x16xf32>, vector<8x16xf32> -> vector<8x16xf32>
    %79 = arith.addf %64, %78 : vector<8x16xf32>
    %c1 = arith.constant 1 : index
    %c0_34 = arith.constant 0 : index
    %c0_35 = arith.constant 0 : index
    %80 = vector.load %arg5[%c1, %c0_34, %c0_35] : memref<3x24x8xf32, #tpu.memory_space<vmem>>, vector<1x24x8xf32>
    %81 = vector.shape_cast %80 : vector<1x24x8xf32> to vector<24x8xf32>
    %cst_36 = arith.constant dense<0.000000e+00> : vector<24x128xf32>
    %82 = tpu.matmul %81, %1, %cst_36 {dimension_numbers = #tpu.dot_dimension_numbers<[1], [0], [0], [1], [0, 0, 1, 1], [], []>} : vector<24x8xf32>, vector<8x128xf32>, vector<24x128xf32> -> vector<24x128xf32>
    %83 = vector.extract_strided_slice %82 {offsets = [0, 0], sizes = [8, 128], strides = [1, 1]} : vector<24x128xf32> to vector<8x128xf32>
    %84 = arith.addf %69, %83 : vector<8x128xf32>
    %85 = vector.extract_strided_slice %82 {offsets = [8, 0], sizes = [8, 128], strides = [1, 1]} : vector<24x128xf32> to vector<8x128xf32>
    %86 = arith.addf %71, %85 : vector<8x128xf32>
    %87 = vector.extract_strided_slice %82 {offsets = [16, 0], sizes = [8, 128], strides = [1, 1]} : vector<24x128xf32> to vector<8x128xf32>
    %88 = arith.addf %73, %87 : vector<8x128xf32>
    %89 = vector.extract_strided_slice %81 {offsets = [0, 0], sizes = [8, 8], strides = [1, 1]} : vector<24x8xf32> to vector<8x8xf32>
    %cst_37 = arith.constant dense<0.000000e+00> : vector<8x16xf32>
    %90 = tpu.matmul %89, %26, %cst_37 {dimension_numbers = #tpu.dot_dimension_numbers<[1], [0], [0], [1], [0, 0, 1, 1], [], []>} : vector<8x8xf32>, vector<8x16xf32>, vector<8x16xf32> -> vector<8x16xf32>
    %91 = arith.addf %76, %90 : vector<8x16xf32>
    %92 = vector.extract_strided_slice %81 {offsets = [16, 0], sizes = [8, 8], strides = [1, 1]} : vector<24x8xf32> to vector<8x8xf32>
    %cst_38 = arith.constant dense<0.000000e+00> : vector<8x16xf32>
    %93 = tpu.matmul %92, %43, %cst_38 {dimension_numbers = #tpu.dot_dimension_numbers<[1], [0], [0], [1], [0, 0, 1, 1], [], []>} : vector<8x8xf32>, vector<8x16xf32>, vector<8x16xf32> -> vector<8x16xf32>
    %94 = arith.addf %79, %93 : vector<8x16xf32>
    %c2 = arith.constant 2 : index
    %c0_39 = arith.constant 0 : index
    %c0_40 = arith.constant 0 : index
    %95 = vector.load %arg5[%c2, %c0_39, %c0_40] : memref<3x24x8xf32, #tpu.memory_space<vmem>>, vector<1x24x8xf32>
    %96 = vector.shape_cast %95 : vector<1x24x8xf32> to vector<24x8xf32>
    %cst_41 = arith.constant dense<0.000000e+00> : vector<24x128xf32>
    %97 = tpu.matmul %96, %18, %cst_41 {dimension_numbers = #tpu.dot_dimension_numbers<[1], [0], [0], [1], [0, 0, 1, 1], [], []>} : vector<24x8xf32>, vector<8x128xf32>, vector<24x128xf32> -> vector<24x128xf32>
    %98 = vector.extract_strided_slice %97 {offsets = [0, 0], sizes = [8, 128], strides = [1, 1]} : vector<24x128xf32> to vector<8x128xf32>
    %99 = arith.addf %84, %98 : vector<8x128xf32>
    %100 = vector.extract_strided_slice %97 {offsets = [8, 0], sizes = [8, 128], strides = [1, 1]} : vector<24x128xf32> to vector<8x128xf32>
    %101 = arith.addf %86, %100 : vector<8x128xf32>
    %102 = vector.extract_strided_slice %97 {offsets = [16, 0], sizes = [8, 128], strides = [1, 1]} : vector<24x128xf32> to vector<8x128xf32>
    %103 = arith.addf %88, %102 : vector<8x128xf32>
    %104 = vector.extract_strided_slice %96 {offsets = [0, 0], sizes = [8, 8], strides = [1, 1]} : vector<24x8xf32> to vector<8x8xf32>
    %cst_42 = arith.constant dense<0.000000e+00> : vector<8x16xf32>
    %105 = tpu.matmul %104, %42, %cst_42 {dimension_numbers = #tpu.dot_dimension_numbers<[1], [0], [0], [1], [0, 0, 1, 1], [], []>} : vector<8x8xf32>, vector<8x16xf32>, vector<8x16xf32> -> vector<8x16xf32>
    %106 = arith.addf %91, %105 : vector<8x16xf32>
    %107 = vector.extract_strided_slice %96 {offsets = [16, 0], sizes = [8, 8], strides = [1, 1]} : vector<24x8xf32> to vector<8x8xf32>
    %cst_43 = arith.constant dense<0.000000e+00> : vector<8x16xf32>
    %108 = tpu.matmul %107, %59, %cst_43 {dimension_numbers = #tpu.dot_dimension_numbers<[1], [0], [0], [1], [0, 0, 1, 1], [], []>} : vector<8x8xf32>, vector<8x16xf32>, vector<8x16xf32> -> vector<8x16xf32>
    %109 = arith.addf %94, %108 : vector<8x16xf32>
    %c0_i32 = arith.constant 0 : i32
    %110 = arith.cmpi sgt, %arg1, %c0_i32 : i32
    %111 = arith.extui %110 : i1 to i32
    %112 = arith.sitofp %111 : i32 to f32
    %113 = vector.broadcast %112 : f32 to vector<8x16xf32>
    %114 = arith.mulf %106, %113 : vector<8x16xf32>
    %c1_i32_44 = arith.constant 1 : i32
    %115 = arith.cmpi slt, %arg1, %c1_i32_44 : i32
    %116 = arith.extui %115 : i1 to i32
    %117 = arith.sitofp %116 : i32 to f32
    %118 = vector.broadcast %117 : f32 to vector<8x16xf32>
    %119 = arith.mulf %109, %118 : vector<8x16xf32>
    %c0_45 = arith.constant 0 : index
    %c0_46 = arith.constant 0 : index
    %120 = vector.load %arg7[%c0_45, %c0_46] : memref<8x128xf32, #tpu.memory_space<vmem>>, vector<8x128xf32>
    tpu.vector_store %arg7[%c0_45, %c0_46], %101 {strides = array<i32>} : memref<8x128xf32, #tpu.memory_space<vmem>>, vector<8x128xf32>,
    %c0_47 = arith.constant 0 : index
    %c0_48 = arith.constant 0 : index
    %121 = vector.load %arg7[%c0_47, %c0_48] : memref<8x128xf32, #tpu.memory_space<vmem>>, vector<8x112xf32>
    %122 = vector.extract_strided_slice %103 {offsets = [0, 16], sizes = [8, 112], strides = [1, 1]} : vector<8x128xf32> to vector<8x112xf32>
    %123 = arith.addf %121, %122 : vector<8x112xf32>
    %c0_49 = arith.constant 0 : index
    %c0_50 = arith.constant 0 : index
    %124 = vector.load %arg7[%c0_49, %c0_50] : memref<8x128xf32, #tpu.memory_space<vmem>>, vector<8x112xf32>
    tpu.vector_store %arg7[%c0_49, %c0_50], %123 {strides = array<i32>} : memref<8x128xf32, #tpu.memory_space<vmem>>, vector<8x112xf32>,
    %c0_51 = arith.constant 0 : index
    %c16 = arith.constant 16 : index
    %125 = vector.load %arg7[%c0_51, %c16] : memref<8x128xf32, #tpu.memory_space<vmem>>, vector<8x112xf32>
    %126 = vector.extract_strided_slice %99 {offsets = [0, 0], sizes = [8, 112], strides = [1, 1]} : vector<8x128xf32> to vector<8x112xf32>
    %127 = arith.addf %125, %126 : vector<8x112xf32>
    %c0_52 = arith.constant 0 : index
    %c16_53 = arith.constant 16 : index
    %128 = vector.load %arg7[%c0_52, %c16_53] : memref<8x128xf32, #tpu.memory_space<vmem>>, vector<8x112xf32>
    tpu.vector_store %arg7[%c0_52, %c16_53], %127 {strides = array<i32>} : memref<8x128xf32, #tpu.memory_space<vmem>>, vector<8x112xf32>,
    %c0_54 = arith.constant 0 : index
    %c112 = arith.constant 112 : index
    %129 = vector.load %arg7[%c0_54, %c112] : memref<8x128xf32, #tpu.memory_space<vmem>>, vector<8x16xf32>
    %130 = arith.addf %129, %119 : vector<8x16xf32>
    %c0_55 = arith.constant 0 : index
    %c112_56 = arith.constant 112 : index
    %131 = vector.load %arg7[%c0_55, %c112_56] : memref<8x128xf32, #tpu.memory_space<vmem>>, vector<8x16xf32>
    tpu.vector_store %arg7[%c0_55, %c112_56], %130 {strides = array<i32>} : memref<8x128xf32, #tpu.memory_space<vmem>>, vector<8x16xf32>,
    %c0_57 = arith.constant 0 : index
    %c0_58 = arith.constant 0 : index
    %132 = vector.load %arg7[%c0_57, %c0_58] : memref<8x128xf32, #tpu.memory_space<vmem>>, vector<8x16xf32>
    %133 = arith.addf %132, %114 : vector<8x16xf32>
    %c0_59 = arith.constant 0 : index
    %c0_60 = arith.constant 0 : index
    %134 = vector.load %arg7[%c0_59, %c0_60] : memref<8x128xf32, #tpu.memory_space<vmem>>, vector<8x16xf32>
    tpu.vector_store %arg7[%c0_59, %c0_60], %133 {strides = array<i32>} : memref<8x128xf32, #tpu.memory_space<vmem>>, vector<8x16xf32>,
    %c0_61 = arith.constant 0 : index
    %c0_62 = arith.constant 0 : index
    %135 = vector.load %arg7[%c0_61, %c0_62] : memref<8x128xf32, #tpu.memory_space<vmem>>, vector<3x128xf32>
    %136 = math.tanh %135 : vector<3x128xf32>
    %c0_63 = arith.constant 0 : index
    %c0_64 = arith.constant 0 : index
    %c0_65 = arith.constant 0 : index
    %137 = vector.load %arg6[%c0_63, %c0_64, %c0_65] : memref<1x3x128xf32, #tpu.memory_space<vmem>>, vector<1x3x128xf32>
    %138 = vector.shape_cast %137 : vector<1x3x128xf32> to vector<3x128xf32>
    %139 = vector.shape_cast %136 : vector<3x128xf32> to vector<1x3x128xf32>
    tpu.vector_store %arg6[%c0_63, %c0_64, %c0_65], %139 {strides = array<i32>} : memref<1x3x128xf32, #tpu.memory_space<vmem>>, vector<1x3x128xf32>,
    return
  }
  func.func @transform_0(%arg0: i32, %arg1: i32) -> (i32, i32, i32) {
    %c0_i32 = arith.constant 0 : i32
    %c0_i32_0 = arith.constant 0 : i32
    return %arg0, %c0_i32, %arg1 : i32, i32, i32
  }
  func.func @transform_1(%arg0: i32, %arg1: i32) -> (i32, i32, i32) {
    %c1_i32 = arith.constant 1 : i32
    %0 = arith.muli %arg1, %c1_i32 : i32
    %c1_i32_0 = arith.constant 1 : i32
    %1 = arith.subi %0, %c1_i32_0 : i32
    %c0_i32 = arith.constant 0 : i32
    %2 = arith.maxsi %1, %c0_i32 : i32
    %c0_i32_1 = arith.constant 0 : i32
    %c0_i32_2 = arith.constant 0 : i32
    return %arg0, %c0_i32_1, %2 : i32, i32, i32
  }
  func.func @transform_2(%arg0: i32, %arg1: i32) -> (i32, i32, i32) {
    %c1_i32 = arith.constant 1 : i32
    %0 = arith.addi %arg1, %c1_i32 : i32
    %c1_i32_0 = arith.constant 1 : i32
    %1 = arith.muli %0, %c1_i32_0 : i32
    %c1_i32_1 = arith.constant 1 : i32
    %2 = arith.minsi %1, %c1_i32_1 : i32
    %c0_i32 = arith.constant 0 : i32
    %c0_i32_2 = arith.constant 0 : i32
    return %arg0, %c0_i32, %2 : i32, i32, i32
  }
  func.func @transform_3(%arg0: i32, %arg1: i32) -> (i32, i32, i32) {
    %c0_i32 = arith.constant 0 : i32
    %c0_i32_0 = arith.constant 0 : i32
    %c0_i32_1 = arith.constant 0 : i32
    %c0_i32_2 = arith.constant 0 : i32
    return %c0_i32, %c0_i32_0, %c0_i32_1 : i32, i32, i32
  }
  func.func @transform_4(%arg0: i32, %arg1: i32) -> (i32, i32, i32) {
    %c0_i32 = arith.constant 0 : i32
    %c0_i32_0 = arith.constant 0 : i32
    return %arg0, %c0_i32, %arg1 : i32, i32, i32
  }
}

</mosaic_0001>

<bundles_post_ra>
// kernel: tpu_custom_call.1
= control target key start
LH: loop header
LB: loop body
LE: loop exit
PB: predicated region body
PF: predicated region fallthrough
CT: control target
= control target key end

     0   :  { %s1528_s15 = smov 0   ;;  %s1530_s16 = smov 0   ;;  %s1708_s0 = inlined_call_operand.vmem [shape: f32[2,8,256], index: 0, kind: input, shape index: {}]   ;;  %s1709_s1 = inlined_call_operand.vmem [shape: f32[2,8,256], index: 1, kind: input, shape index: {}]   ;;  %s1710_s2 = inlined_call_operand.vmem [shape: f32[2,8,256], index: 2, kind: input, shape index: {}]   ;;  %s1711_s3 = inlined_call_operand.vmem [shape: f32[3,24,8], index: 3, kind: input, shape index: {}]   ;;  %s1712_s4 = inlined_call_operand.vmem [shape: f32[2,3,256], index: 4, kind: output, shape index: {}]  }
   0x1   :  { %s1532_s17 = smov 0   ;;  %s1534_s18 = smov 0  }
   0x2   :  { %s1536_s19 = smov 0  }
   0x3 LB: > { %s23_s20 = sadd.s32 1, %s1487_s17  ;;  %s26_s21 = sadd.s32 1, %s1491_s18  ;;  %s1495_s19 = sphi %s1536_s19, %s14_s19   ;;  %s1491_s18 = sphi %s1534_s18, %s1720_s18   ;;  %s1487_s17 = sphi %s1532_s17, %s1719_s17   ;;  %s1483_s16 = sphi %s1530_s16, %s1718_s16   ;;  %s1479_s15 = sphi %s1528_s15, %s1717_s15  }
   0x4   : > { %p24_p0 = scmp.ge.s32.totalorder %s23_s20, 2  ;;  %p1255_p1 = scmp.ge.s32.totalorder %s1495_s19, 1 }
   0x5   : > { %p235_p2 = scmp.lt.s32.totalorder %s1495_s19, 5 }
   0x6   : > { %s1722_s20 = smov (%p24_p0, %s23_s20), 0  ;;  %s1724_s21 = smov (!%p24_p0, %s26_s21), %s1491_s18 }
   0x7   : > { %p236_p3 = pnand %p1255_p1, %p235_p2  ;;  %p28_p4 = scmp.ge.s32.totalorder %s1724_s21, 2 }
   0x8   : > { %p289_p5 = scmp.lt.s32.totalorder (!%p236_p3), %s1483_s16, 1  ;;  %p291_p6 = scmp.lt.s32.totalorder (!%p236_p3), %s1479_s15, 1  ;;  %v1497_v0 = vmov (!%p236_p3), 0.0   ;;  %vm1498_vm0 = vmmov (!%p236_p3), 0   ;;  %v334_v4 = vlaneseq (!%p236_p3)  ;;  %v363_v8 = vld [vmem:[%s1711_s3] sm:$0xff] (!%p236_p3)  ;;  %vm366_vm2 = vcmask (!%p236_p3), 64512  }
   0x9   : > { %s1726_s21 = smov (%p28_p4, %s1724_s21), 0  ;;  %239 = sbr.rel (%p236_p3) target bundleno = 640 (0x280), region = 36 }
   0xa   : > { %s1258_s22 = sadd.s32 (!%p236_p3), 4294967295, %s1479_s15  ;;  %1326 = vmatprep.subr.mxu0 (!%p236_p3), %v1497_v0  ;;  %1328 = vmatprep.mubr.msk.f32.mxu0 (!%p236_p3), %vm1498_vm0, %v1497_v0  ;;  %s1499_s30 = smov (!%p236_p3), 1   ;;  %v335_v5 = vand.u32 (!%p236_p3), 127, %v334_v4  ;;  %v364_v10 = vld [vmem:[%s1711_s3 + $0x8] sm:$0xff] (!%p236_p3)  ;;  %v365_v11 = vld [vmem:[%s1711_s3 + $0x10] sm:$0xff] (!%p236_p3)  ;;  %v1277_v13 = vld [vmem:[%s1711_s3 + $0x18] sm:$0xff] (!%p236_p3) }
   0xb   : > { %1389 = vmatprep.subr.mxu1 (!%p236_p3), %v1497_v0  ;;  %1331 = vmatprep.mubr.msk.f32.mxu1 (!%p236_p3), %vm1498_vm0, %v1497_v0  ;;  %p298_p7 = scmp.gt.s32.totalorder (!%p236_p3), %s1258_s22, 0  ;;  %p1259_p8 = scmp.lt.s32.totalorder (!%p236_p3), %s1258_s22, 1  ;;  %v1278_v17 = vld [vmem:[%s1711_s3 + $0x20] sm:$0xff] (!%p236_p3)  ;;  %v1279_v20 = vld [vmem:[%s1711_s3 + $0x28] sm:$0xff] (!%p236_p3)  ;;  %v1288_v22 = vld [vmem:[%s1711_s3 + $0x30] sm:$0xff] (!%p236_p3)  ;;  %vm1102_vm4 = vcmask (!%p236_p3), 916480  }
   0xc   : > { %s311_s5 = sadd.s32 (!%p236_p3), 1, %s1479_s15  ;;  %s1500_s8 = smov (!%p236_p3), 127   ;;  %v336_v6 = vand.u32 (!%p236_p3), 15, %v335_v5  ;;  %v1289_v23 = vld [vmem:[%s1711_s3 + $0x38] sm:$0xff] (!%p236_p3)  ;;  %v1290_v24 = vld [vmem:[%s1711_s3 + $0x40] sm:$0xff] (!%p236_p3)  ;;  %vm1110_vm5 = vcmask (!%p236_p3), 1047680  }
   0xd   : > { %p312_p9 = scmp.lt.s32.totalorder (!%p236_p3), %s311_s5, 1  ;;  %p1085_p10 = scmp.gt.s32.totalorder (!%p236_p3), %s1479_s15, 0  ;;  %vm1118_vm6 = vcmask (!%p236_p3), 1048448   ;;  %vm1122_vm7 = vcmask (!%p236_p3), 130048  }
   0xe   : > { %vm1585_vm1 = vcmp.ge.s32.totalorder (!%p236_p3), %v336_v6, 1  ;;  %vm1618_vm3 = vcmp.le.s32.totalorder (!%p236_p3), %v336_v6, 14 }
  0x10   : > { %s1728_s16 = smov (!%p289_p5, %s1483_s16), 1  ;;  %s1730_s22 = smov (!%p298_p7, %s1258_s22), 0 }
  0x11   : > { %s292_s23 = scalar_select %p291_p6, %s1479_s15, 1 }
  0x12   : > { %s1256_s24 = sshll.u32 %s1728_s16, 1  ;;  %s1732_s22 = smov (!%p1259_p8, %s1730_s22), 1 }
  0x13   : > { %s1571_s25 = sadd.s32 %s1256_s24, %s292_s23  ;;  %s305_s6 = sadd.s32 %s1732_s22, %s1256_s24 }
  0x14   : > { %s1257_s26 = sshll.u32 %s1571_s25, 3  ;;  %s1265_s7 = sshll.u32 %s305_s6, 3 }
  0x15   : > { %s296_s29 = scalar_lea.vmem %s1708_s0, %s1257_s26  ;;  %s307_s11 = scalar_lea.vmem %s1709_s1, %s1265_s7 }
  0x16   : > { %v333_v1 = vld [vmem:[%s296_s29] sm:$0xff]  ;;  %s1734_s5 = smov (!%p312_p9, %s311_s5), 1  ;;  %s1501_s22 = smov 16  }
  0x17   : > { %338 = vrot.lane.b32.xlu1 %v333_v1, %s1499_s30  ;;  %v349_v2 = vld [vmem:[%s307_s11] sm:$0xff]  ;;  %s1736_s5 = smov (!%p312_p9, %s1734_s5), 1  ;;  %s1272_s29 = sshll.u32 %s1571_s25, 2 }
  0x18   : > { %351 = vrot.lane.b32.xlu0 %v349_v2, %s1499_s30  ;;  %s319_s12 = sadd.s32 %s1256_s24, %s1736_s5  ;;  %s1502_s24 = smov 112  }
  0x19   : > { %s1270_s13 = sshll.u32 %s319_s12, 3  ;;  %s332_s15 = scalar_lea.vmem %s1712_s4, %s1272_s29 }
  0x1a   : > { %s321_s23 = scalar_lea.vmem %s1710_s2, %s1270_s13 }
  0x1b   : > { %344 = vrot.lane.b32.xlu1 %v333_v1, %s1500_s8  ;;  %v350_v3 = vld [vmem:[%s321_s23] sm:$0xff]  ;;  %s1091_s26 = scalar_select %p291_p6, 1, 0 }
  0x1c   : > { %354 = vrot.lane.b32.xlu0 %v349_v2, %s1500_s8 }
  0x1d   : > { %s1092_s27 = scvt.s32.f32 %s1091_s26 }
  0x1f   : > { %v1093_v43 = vstv %s1092_s27 }
  0x20   : > { %556 = vrot.lane.b32.xlu0 %v349_v2, %s1501_s22 }
  0x24   : > { %357 = vrot.lane.b32.xlu0 %v350_v3, %s1499_s30 }
  0x28   : > { %360 = vrot.lane.b32.xlu0 %v350_v3, %s1500_s8 }
  0x89   : > { %v339_v9 = vpop.permute.xlu1 %338 }
  0x8a   : > { %1327 = vmatpush3.msk.msra.mxu0 %vm1585_vm1, %v339_v9  ;;  %1390 = vmatpush3.msk.msra.mxu1 %vm1585_vm1, %v339_v9  ;;  %v352_v12 = vpop.permute.xlu0 %351 }
  0x8b   : > { %1329 = vmatmul.mubr.msk.f32.vlgmr.msra.gmra.mrb[0].mxu0 %vm366_vm2, %v363_v8  ;;  %1337 = vmatprep.subr.mxu0 %v1497_v0  ;;  %v353_v14 = vsel %vm1585_vm1, %v352_v12, 0.0 }
  0x8c   : > { %1338 = vmatpush3.msra.mxu0 %v333_v1  ;;  %1339 = vmatprep.mubr.msk.f32.mxu0 %vm1498_vm0, %v1497_v0 }
  0x8d   : > { %1368 = vmatprep.subr.mxu0 %v1497_v0  ;;  %1332 = vmatmul.mubr.msk.f32.vlgmr.msra.gmra.mrb[0].mxu1 %vm366_vm2, %v364_v10  ;;  %v345_v15 = vpop.permute.xlu1 %344 }
  0x8e   : > { %1334 = vmatprep.mubr.msk.f32.mxu1 %vm1498_vm0, %v1497_v0  ;;  %1348 = vmatprep.subr.mxu1 %v1497_v0  ;;  %v355_v18 = vpop.permute.xlu0 %354 }
  0x8f   : > { %630 = vrot.lane.b32.xlu1 %v353_v14, %s1501_s22  ;;  %v356_v19 = vsel %vm1618_vm3, %v355_v18, 0.0 }
  0x91   : > { %1335 = vmatmul.mubr.msk.f32.gmra.mrb[2].mxu1 %vm366_vm2, %v365_v11 }
  0x92   : > { %1350 = vmatprep.mubr.msk.f32.mxu1 %vm1498_vm0, %v1497_v0  ;;  %v557_v21 = vpop.permute.xlu0 %556 }
  0x93   : > { %1340 = vmatmul.mubr.msk.f32.vlgmr.msra.gmra.mrb[0].mxu0 %vm366_vm2, %v1277_v13  ;;  %940 = vrot.lane.b32.xlu1 %v356_v19, %s1501_s22 }
  0x94   : > { %1342 = vmatprep.mubr.msk.f32.mxu0 %vm1498_vm0, %v1497_v0  ;;  %1369 = vmatpush3.msk.msra.mxu0 %vm1618_vm3, %v345_v15 }
  0x95   : > { %1349 = vmatpush3.msra.mxu1 %v557_v21 }
  0x96   : > { %1351 = vmatmul.mubr.msk.f32.vlgmr.msra.gmra.mrb[4].mxu1 %vm366_vm2, %v1277_v13  ;;  %1353 = vmatprep.subr.mxu1 %v1497_v0  ;;  %v358_v26 = vpop.permute.xlu0 %357 }
  0x97   : > { %1343 = vmatmul.mubr.msk.f32.gmra.mrb[2].mxu0 %vm366_vm2, %v1278_v17  ;;  %1355 = vmatprep.mubr.msk.f32.mxu1 %vm1498_vm0, %v1497_v0 }
  0x98   : > { %1345 = vmatprep.mubr.msk.f32.mxu0 %vm1498_vm0, %v1497_v0 }
  0x9a   : > { %v361_v28 = vpop.permute.xlu0 %360 }
  0x9b   : > { %1346 = vmatmul.mubr.msk.f32.gmra.mrb[4].mxu0 %vm366_vm2, %v1279_v20 }
  0x9c   : > { %1370 = vmatprep.mubr.msk.f32.mxu0 %vm1498_vm0, %v1497_v0 }
  0x9f   : > { %1371 = vmatmul.mubr.msk.f32.vlgmr.msra.gmra.mrb[0].mxu0 %vm366_vm2, %v1288_v22 }
  0xa0   : > { %1373 = vmatprep.mubr.msk.f32.mxu0 %vm1498_vm0, %v1497_v0 }
  0xa3   : > { %1374 = vmatmul.mubr.msk.f32.gmra.mrb[2].mxu0 %vm366_vm2, %v1289_v23 }
  0xa4   : > { %1376 = vmatprep.mubr.msk.f32.mxu0 %vm1498_vm0, %v1497_v0 }
  0xa7   : > { %1377 = vmatmul.mubr.msk.f32.gmra.mrb[4].mxu0 %vm366_vm2, %v1290_v24 }
 0x101   : > { %v631_v25 = vpop.permute.xlu1 %630 }
 0x102   : > { %1354 = vmatpush3.msra.mxu1 %v631_v25 }
 0x103   : > { %1356 = vmatmul.mubr.msk.f32.vlgmr.msra.gmra.mrb[4].mxu1 %vm366_vm2, %v363_v8  ;;  %1358 = vmatprep.subr.mxu1 %v1497_v0 }
 0x104   : > { %1359 = vmatpush3.msra.mxu1 %v350_v3  ;;  %1360 = vmatprep.mubr.msk.f32.mxu1 %vm1498_vm0, %v1497_v0 }
 0x105   : > { %1363 = vmatprep.subr.mxu1 %v1497_v0  ;;  %v941_v27 = vpop.permute.xlu1 %940 }
 0x107   : > { %1361 = vmatmul.mubr.msk.f32.vlgmr.msra.gmra.mrb[6].mxu1 %vm366_vm2, %v1279_v20 }
 0x108   : > { %1364 = vmatpush3.msk.msra.mxu1 %vm1585_vm1, %v358_v26  ;;  %1365 = vmatprep.mubr.msk.f32.mxu1 %vm1498_vm0, %v1497_v0 }
 0x109   : > { %1379 = vmatprep.subr.mxu1 %v1497_v0 }
 0x10f   : > { %1366 = vmatmul.mubr.msk.f32.vlgmr.msra.gmra.mrb[6].mxu1 %vm366_vm2, %v365_v11 }
 0x110   : > { %1380 = vmatpush3.msra.mxu1 %v941_v27  ;;  %1381 = vmatprep.mubr.msk.f32.mxu1 %vm1498_vm0, %v1497_v0 }
 0x111   : > { %1384 = vmatprep.subr.mxu1 %v1497_v0 }
 0x113   : > { %1382 = vmatmul.mubr.msk.f32.vlgmr.msra.gmra.mrb[4].mxu1 %vm366_vm2, %v1288_v22 }
 0x114   : > { %1385 = vmatpush3.msk.msra.mxu1 %vm1618_vm3, %v361_v28  ;;  %1386 = vmatprep.mubr.msk.f32.mxu1 %vm1498_vm0, %v1497_v0 }
 0x117   : > { %1387 = vmatmul.mubr.msk.f32.vlgmr.msra.gmra.mrb[6].mxu1 %vm366_vm2, %v1290_v24 }
 0x160   : > { %v447_v29 = vpop.f32.mrb[0].mxu1 }
 0x161   : > { %v1333_v30 = vpop.f32.mrb[1].mxu1 }
 0x164   : > { %v452_v31 = vpop.f32.mrb[2].mxu1 }
 0x165   : > { %v1336_v32 = vpop.f32.mrb[3].mxu1 }
 0x172   : > { %v922_v33 = vpop.f32.mrb[0].mxu0 }
 0x173   : > { %v1372_v34 = vpop.f32.mrb[1].mxu0  ;;  %1106 = vrot.lane.b32.xlu0 %v922_v33, %s1501_s22  ;;  %s1086_s22 = scalar_select %p1085_p10, 1, 0 }
 0x175   : > { %s1087_s28 = scvt.s32.f32 %s1086_s22 }
 0x176   : > { %v927_v35 = vpop.f32.mrb[2].mxu0 }
 0x177   : > { %v1391_v36 = vadd.f32 %v927_v35, %v447_v29  ;;  %v1375_v37 = vpop.f32.mrb[3].mxu0  ;;  %v1088_v55 = vstv %s1087_s28 }
 0x179   : > { %1095 = vst [vmem:[#allocation2] sm:$0xff] %v1391_v36 }
 0x17a   : > { %v932_v38 = vpop.f32.mrb[4].mxu0 }
 0x17b   : > { %v1392_v39 = vadd.f32 %v932_v38, %v452_v31  ;;  %v1378_v40 = vpop.f32.mrb[5].mxu0 }
 0x17d   : > { %1098 = vrot.lane.b32.xlu1 %v1392_v39, %s1502_s24 }
 0x1e5   : > { %v1107_v49 = vpop.permute.xlu0 %1106 }
 0x1e6   : > { %v1009_v41 = vpop.f32.mrb[4].mxu1 }
 0x1e7   : > { %v1383_v42 = vpop.f32.mrb[5].mxu1  ;;  %v1089_v56 = vmul.f32 %v1088_v55, %v1009_v41 }
 0x1ea   : > { %v1080_v44 = vpop.f32.mrb[6].mxu1 }
 0x1eb   : > { %v1094_v45 = vmul.f32 %v1093_v43, %v1080_v44  ;;  %v1388_v46 = vpop.f32.mrb[7].mxu1 }
 0x1ed   : > { %1114 = vrot.lane.b32.xlu1 %v1094_v45, %s1502_s24 }
 0x1ef   : > { %v1099_v47 = vpop.permute.xlu1 %1098 }
 0x1f0   : > { %v1101_v48 = vadd.f32 %v1391_v36, %v1099_v47 }
 0x1f2   : > { %1103 = vst.msk [vmem:[#allocation2] sm:$0xff] %vm1102_vm4, %v1101_v48 }
 0x1f9   : > { %v1104_v50 = vld [vmem:[#allocation2] sm:$0xff] }
 0x1fa   : > { %v1109_v51 = vadd.f32 %v1107_v49, %v1104_v50 }
 0x1fc   : > { %1111 = vst.msk [vmem:[#allocation2] sm:$0xff] %vm1110_vm5, %v1109_v51 }
 0x203   : > { %v1112_v52 = vld [vmem:[#allocation2] sm:$0xff] }
 0x25f   : > { %v1115_v53 = vpop.permute.xlu1 %1114 }
 0x260   : > { %v1117_v54 = vadd.f32 %v1115_v53, %v1112_v52 }
 0x262   : > { %1119 = vst.msk [vmem:[#allocation2] sm:$0xff] %vm1118_vm6, %v1117_v54 }
 0x269   : > { %v1120_v57 = vld [vmem:[#allocation2] sm:$0xff] }
 0x26a   : > { %v1121_v58 = vadd.f32 %v1120_v57, %v1089_v56 }
 0x26c   : > { %1123 = vst.msk [vmem:[#allocation2] sm:$0xff] %vm1122_vm7, %v1121_v58 }
 0x273   : > { %v1124_v59 = vld [vmem:[#allocation2] sm:$0x7] }
 0x274   : > { %1455 = vtanh.f32 %v1124_v59 }
 0x27e   : > { %v1456_v60 = vpop.eup %1455 }
 0x27f   : > { %1126 = vst [vmem:[%s332_s15] sm:$0x7] %v1456_v60 }
 0x280 PF: > { %s14_s19 = sadd.s32 1, %s1495_s19   ;;  %s1717_s15 = smov %s1487_s17 }
 0x281   : > { %p11_p11 = scmp.ge.s32.totalorder %s14_s19, 6   ;;  %s1718_s16 = smov %s1491_s18 }
 0x282   : > { %s1719_s17 = smov %s1722_s20  ;;  %s1720_s18 = smov %s1726_s21 }
 0x283   :  { %13 = sbr.rel (!%p11_p11) target bundleno = 3 (0x3), region = 74 }

</bundles_post_ra>
